<compile_context>
chip_gen: v6e
topology: v6e:2x2x1
jax: 0.10.0
libtpu: 0.0.40
codegen_flags: <defaults>
</compile_context>

<pallas_src>
import functools

import jax
import jax.numpy as jnp
from jax import lax
from jax.experimental import pallas as pl
from jax.experimental.pallas import tpu as pltpu


def attention_kernel(gamma_ref, x_ref, w_ref, b_ref, o_ref, *,
                     cq, n, bt, matmul_dtype):
    # x_ref: (C, bt*N) slab -- bt batches side-by-side on the lane axis.
    xs = x_ref[...]                                  # f32 (C, bt*N)
    w = w_ref[...]                                   # (2*Cq + C, C)
    x_mm = xs if matmul_dtype is None else xs.astype(matmul_dtype)
    w_mm = w if matmul_dtype is None else w.astype(matmul_dtype)

    # Fused 1x1-conv projections: one matmul yields f, g, h for all bt batches.
    p = jnp.dot(w_mm, x_mm, preferred_element_type=jnp.float32) + b_ref[...]
    p = jnp.maximum(p, 0.0)                          # (2*Cq + C, bt*N), f32

    gamma = gamma_ref[0]
    outs = []
    for b in range(bt):
        sl = slice(b * n, (b + 1) * n)
        f = p[:cq, sl]                               # (Cq, N)
        g = p[cq:2 * cq, sl]                         # (Cq, N)
        h = p[2 * cq:, sl]                           # (C,  N)
        if matmul_dtype is not None:
            f, g, h = (t.astype(matmul_dtype) for t in (f, g, h))

        # s = g^T @ f without materializing a transpose (contract over axis 0).
        s = lax.dot_general(g, f, (((0,), (0,)), ((), ())),
                            preferred_element_type=jnp.float32)   # (N, N)
        s = s - jnp.max(s, axis=-1, keepdims=True)
        e = jnp.exp(s)
        beta = e * pl.reciprocal(jnp.sum(e, axis=-1, keepdims=True),
                                 approx=True)                      # (N, N)
        if matmul_dtype is not None:
            beta = beta.astype(matmul_dtype)

        o = jnp.dot(h, beta, preferred_element_type=jnp.float32)   # (C, N)
        outs.append(gamma * o + xs[:, sl])

    # Single lane-dense store covering all bt batches of this grid step.
    o_ref[...] = jnp.concatenate(outs, axis=-1).astype(o_ref.dtype)


def attention_unit_pallas(x, wf, bf, wg, bg, wh, bh, gamma, *,
                          batch_block=None, matmul_dtype=None):
    B, C, N = x.shape
    Cq = wf.shape[0]

    if batch_block is None:
        batch_block = 1
        for cand in (8, 4, 2):
            if B % cand == 0 and B // cand >= 2:   # keep >=2 grid steps (v7x 2 TCs)
                batch_block = cand
                break
    bt = batch_block
    assert B % bt == 0, "batch_block must divide the batch size"
    G = B // bt

    # Stack the three 1x1-conv weights/biases -> one fused projection matmul.
    w_all = jnp.concatenate([wf, wg, wh], axis=0)                  # (2Cq+C, C)
    b_all = jnp.concatenate([bf, bg, bh], axis=0).reshape(-1, 1)   # (2Cq+C, 1)
    gamma1 = gamma.reshape(1).astype(jnp.float32)

    # Lane-dense slab layout: bt batches side-by-side along the last (lane) dim.
    x_slab = (x.reshape(G, bt, C, N)
               .transpose(0, 2, 1, 3)
               .reshape(G, C, bt * N))

    kernel = functools.partial(attention_kernel, cq=Cq, n=N, bt=bt,
                               matmul_dtype=matmul_dtype)

    # Explicit scoped-VMEM budget (never below the default, capped under 64 MiB).
    f32 = 4
    est = (2 * 2 * C * bt * N * f32                            # x & out slabs, 2 bufs
           + 2 * ((2 * Cq + C) * C + (2 * Cq + C)) * f32       # stacked W + bias
           + (2 * Cq + C) * bt * N * f32                       # projection slab p
           + bt * (3 * N * N + 2 * C * N) * f32)               # s/e/beta, o, out
    vmem_limit = int(min(64 << 20, max(32 << 20, 4 * est)))

    full = lambda shape: pl.BlockSpec(shape, lambda g: (0,) * len(shape))
    slab_spec = pl.BlockSpec((pl.Squeezed(), C, bt * N), lambda g: (g, 0, 0))

    out_slab = pl.pallas_call(
        kernel,
        out_shape=jax.ShapeDtypeStruct((G, C, bt * N), x.dtype),
        grid_spec=pltpu.PrefetchScalarGridSpec(
            num_scalar_prefetch=0,
            grid=(G,),
            in_specs=[
                pl.BlockSpec(memory_space=pltpu.MemorySpace.SMEM),  # gamma (1,)
                slab_spec,                                          # x slab
                full((2 * Cq + C, C)),                              # stacked W
                full((2 * Cq + C, 1)),                              # stacked bias
            ],
            out_specs=slab_spec,
        ),
        compiler_params=pltpu.CompilerParams(
            dimension_semantics=("parallel",),
            vmem_limit_bytes=vmem_limit),
    )(gamma1, x_slab, w_all, b_all)

    return (out_slab.reshape(G, C, bt, N)
                    .transpose(0, 2, 1, 3)
                    .reshape(B, C, N))


def attention_unit_ref(x, wf, bf, wg, bg, wh, bh, gamma):
    # pure-JAX reference of the PyTorch forward
    f = jax.nn.relu(jnp.einsum("oc,bcn->bon", wf, x) + bf[None, :, None])
    g = jax.nn.relu(jnp.einsum("oc,bcn->bon", wg, x) + bg[None, :, None])
    h = jax.nn.relu(jnp.einsum("oc,bcn->bon", wh, x) + bh[None, :, None])
    s = jnp.einsum("bcn,bcm->bnm", g, f)            # g.permute(0,2,1) @ f
    beta = jax.nn.softmax(s, axis=2)
    o = jnp.einsum("bcn,bnm->bcm", h, beta)
    return gamma * o + x


if __name__ == "__main__":
    B, C, N = 2, 16, 16          # small shapes; C//4 = 4
    Cq = C // 4

    key = jax.random.PRNGKey(0)
    ks = jax.random.split(key, 8)
    x  = jax.random.normal(ks[0], (B, C, N), dtype=jnp.float32)
    wf = jax.random.normal(ks[1], (Cq, C), dtype=jnp.float32) * 0.1
    bf = jax.random.normal(ks[2], (Cq,),   dtype=jnp.float32) * 0.1
    wg = jax.random.normal(ks[3], (Cq, C), dtype=jnp.float32) * 0.1
    bg = jax.random.normal(ks[4], (Cq,),   dtype=jnp.float32) * 0.1
    wh = jax.random.normal(ks[5], (C, C),  dtype=jnp.float32) * 0.1
    bh = jax.random.normal(ks[6], (C,),    dtype=jnp.float32) * 0.1
    # PyTorch inits gamma = 0 (output == input); use a nonzero value so the
    # attention path is actually exercised.
    gamma = jnp.array([0.5], dtype=jnp.float32)

    ref = attention_unit_ref(x, wf, bf, wg, bg, wh, bh, gamma)

    # f32 MXU operands, one batch per grid step (2 parallel steps -> megacore).
    out = attention_unit_pallas(x, wf, bf, wg, bg, wh, bh, gamma,
                                batch_block=1, matmul_dtype=None)
    out = jax.block_until_ready(out)
    assert out.shape == (B, C, N)
    assert jnp.allclose(out, ref, atol=5e-3, rtol=5e-3)   # approx reciprocal

    # bf16 MXU operands (v6e/v7x feedback) + batch-blocked slab (2 batches/step).
    out_bf16 = attention_unit_pallas(x, wf, bf, wg, bg, wh, bh, gamma,
                                     batch_block=2, matmul_dtype=jnp.bfloat16)
    out_bf16 = jax.block_until_ready(out_bf16)
    assert jnp.allclose(out_bf16, ref, atol=5e-2, rtol=5e-2)

    print("KERNEL_OK")
</pallas_src>

<mosaic_0001>
module attributes {stable_mosaic.version = 11 : i64} {
  func.func @attention_kernel(%arg0: i32, %arg1: memref<1xf32, #tpu.memory_space<smem>>, %arg2: memref<1x16x16xf32, #tpu.memory_space<vmem>>, %arg3: memref<24x16xf32, #tpu.memory_space<vmem>>, %arg4: memref<24x1xf32, #tpu.memory_space<vmem>>, %arg5: memref<1x16x16xf32, #tpu.memory_space<vmem>>) attributes {dimension_semantics = [#tpu.dimension_semantics<parallel>], iteration_bounds = array<i64: 2>, scalar_prefetch = 0 : i64, scratch_operands = 0 : i64, tpu.core_type = #tpu.core_type<tc>, window_params = [{transform_indices = @transform_0, window_bounds = array<i64: 1>}, {transform_indices = @transform_1, window_bounds = array<i64: 1, 16, 16>}, {pipeline_mode = #tpu.pipeline_mode<synchronous>, transform_indices = @transform_2, window_bounds = array<i64: 24, 16>}, {pipeline_mode = #tpu.pipeline_mode<synchronous>, transform_indices = @transform_3, window_bounds = array<i64: 24, 1>}, {transform_indices = @transform_4, window_bounds = array<i64: 1, 16, 16>}]} {
    %c0 = arith.constant 0 : index
    %c0_0 = arith.constant 0 : index
    %c0_1 = arith.constant 0 : index
    %0 = vector.load %arg2[%c0, %c0_0, %c0_1] : memref<1x16x16xf32, #tpu.memory_space<vmem>>, vector<1x16x16xf32>
    %1 = vector.shape_cast %0 : vector<1x16x16xf32> to vector<16x16xf32>
    %c0_2 = arith.constant 0 : index
    %c0_3 = arith.constant 0 : index
    %2 = vector.load %arg3[%c0_2, %c0_3] : memref<24x16xf32, #tpu.memory_space<vmem>>, vector<24x16xf32>
    %cst = arith.constant dense<0.000000e+00> : vector<24x16xf32>
    %3 = tpu.matmul %2, %1, %cst {dimension_numbers = #tpu.dot_dimension_numbers<[1], [0], [0], [1], [0, 0, 1, 1], [], []>} : vector<24x16xf32>, vector<16x16xf32>, vector<24x16xf32> -> vector<24x16xf32>
    %c0_4 = arith.constant 0 : index
    %c0_5 = arith.constant 0 : index
    %4 = vector.load %arg4[%c0_4, %c0_5] : memref<24x1xf32, #tpu.memory_space<vmem>>, vector<24x1xf32>
    %5 = vector.broadcast %4 : vector<24x1xf32> to vector<24x16xf32>
    %6 = arith.addf %3, %5 : vector<24x16xf32>
    %cst_6 = arith.constant 0.000000e+00 : f32
    %7 = vector.broadcast %cst_6 : f32 to vector<24x16xf32>
    %8 = arith.maximumf %6, %7 : vector<24x16xf32>
    %c0_7 = arith.constant 0 : index
    %9 = memref.load %arg1[%c0_7] : memref<1xf32, #tpu.memory_space<smem>>
    %10 = vector.extract_strided_slice %8 {offsets = [0, 0], sizes = [4, 16], strides = [1, 1]} : vector<24x16xf32> to vector<4x16xf32>
    %11 = vector.extract_strided_slice %8 {offsets = [4, 0], sizes = [4, 16], strides = [1, 1]} : vector<24x16xf32> to vector<4x16xf32>
    %12 = vector.extract_strided_slice %8 {offsets = [8, 0], sizes = [16, 16], strides = [1, 1]} : vector<24x16xf32> to vector<16x16xf32>
    %cst_8 = arith.constant dense<0.000000e+00> : vector<16x16xf32>
    %13 = tpu.matmul %11, %10, %cst_8 {dimension_numbers = #tpu.dot_dimension_numbers<[0], [0], [1], [1], [0, 1, 1, 1], [], []>} : vector<4x16xf32>, vector<4x16xf32>, vector<16x16xf32> -> vector<16x16xf32>
    %cst_9 = arith.constant dense<0xFF800000> : vector<16xf32>
    %14 = vector.multi_reduction <maximumf>, %13, %cst_9 [1] : vector<16x16xf32> to vector<16xf32>
    %15 = vector.shape_cast %14 : vector<16xf32> to vector<16x1xf32>
    %16 = vector.broadcast %15 : vector<16x1xf32> to vector<16x16xf32>
    %17 = arith.subf %13, %16 : vector<16x16xf32>
    %18 = math.exp %17 : vector<16x16xf32>
    %cst_10 = arith.constant dense<0.000000e+00> : vector<16xf32>
    %19 = vector.multi_reduction <add>, %18, %cst_10 [1] : vector<16x16xf32> to vector<16xf32>
    %20 = vector.shape_cast %19 : vector<16xf32> to vector<16x1xf32>
    %21 = tpu.reciprocal %20 {approx = true} : vector<16x1xf32> -> vector<16x1xf32>
    %22 = vector.broadcast %21 : vector<16x1xf32> to vector<16x16xf32>
    %23 = arith.mulf %18, %22 : vector<16x16xf32>
    %cst_11 = arith.constant dense<0.000000e+00> : vector<16x16xf32>
    %24 = tpu.matmul %12, %23, %cst_11 {dimension_numbers = #tpu.dot_dimension_numbers<[1], [0], [0], [1], [0, 0, 1, 1], [], []>} : vector<16x16xf32>, vector<16x16xf32>, vector<16x16xf32> -> vector<16x16xf32>
    %25 = vector.broadcast %9 : f32 to vector<16x16xf32>
    %26 = arith.mulf %25, %24 : vector<16x16xf32>
    %27 = arith.addf %26, %1 : vector<16x16xf32>
    %c0_12 = arith.constant 0 : index
    %c0_13 = arith.constant 0 : index
    %c0_14 = arith.constant 0 : index
    %28 = vector.load %arg5[%c0_12, %c0_13, %c0_14] : memref<1x16x16xf32, #tpu.memory_space<vmem>>, vector<1x16x16xf32>
    %29 = vector.shape_cast %28 : vector<1x16x16xf32> to vector<16x16xf32>
    %30 = vector.shape_cast %27 : vector<16x16xf32> to vector<1x16x16xf32>
    tpu.vector_store %arg5[%c0_12, %c0_13, %c0_14], %30 {strides = array<i32>} : memref<1x16x16xf32, #tpu.memory_space<vmem>>, vector<1x16x16xf32>,
    return
  }
  func.func @transform_0(%arg0: i32) -> i32 {
    %c0_i32 = arith.constant 0 : i32
    %c0_i32_0 = arith.constant 0 : i32
    return %c0_i32 : i32
  }
  func.func @transform_1(%arg0: i32) -> (i32, i32, i32) {
    %c0_i32 = arith.constant 0 : i32
    %c0_i32_0 = arith.constant 0 : i32
    %c0_i32_1 = arith.constant 0 : i32
    return %arg0, %c0_i32, %c0_i32_0 : i32, i32, i32
  }
  func.func @transform_2(%arg0: i32) -> (i32, i32) {
    %c0_i32 = arith.constant 0 : i32
    %c0_i32_0 = arith.constant 0 : i32
    %c0_i32_1 = arith.constant 0 : i32
    return %c0_i32, %c0_i32_0 : i32, i32
  }
  func.func @transform_3(%arg0: i32) -> (i32, i32) {
    %c0_i32 = arith.constant 0 : i32
    %c0_i32_0 = arith.constant 0 : i32
    %c0_i32_1 = arith.constant 0 : i32
    return %c0_i32, %c0_i32_0 : i32, i32
  }
  func.func @transform_4(%arg0: i32) -> (i32, i32, i32) {
    %c0_i32 = arith.constant 0 : i32
    %c0_i32_0 = arith.constant 0 : i32
    %c0_i32_1 = arith.constant 0 : i32
    return %arg0, %c0_i32, %c0_i32_0 : i32, i32, i32
  }
}

</mosaic_0001>

<bundles_post_ra>
// kernel: tpu_custom_call.1
= control target key start
LH: loop header
LB: loop body
LE: loop exit
PB: predicated region body
PF: predicated region fallthrough
CT: control target
= control target key end

     0   :  { %s971_s0 = inlined_call_operand.<no memory space> [shape: f32[1], index: 0, kind: input, shape index: {}]   ;;  %s972_s1 = inlined_call_operand.vmem [shape: f32[2,16,16], index: 1, kind: input, shape index: {}]   ;;  %s973_s2 = inlined_call_operand.vmem [shape: f32[24,16], index: 2, kind: input, shape index: {}]   ;;  %s974_s3 = inlined_call_operand.vmem [shape: f32[24,1], index: 3, kind: input, shape index: {}]   ;;  %s975_s4 = inlined_call_operand.hbm [shape: f32[2,16,16], index: 4, kind: output, shape index: {}]  }
   0x1   :  { %9 = sst [smem:[#allocation2]] %s971_s0 }
   0x2   :  { %10 = vsyncpa [#allocation4], 0 }
   0x3   :  { %12 = vsyncpa [#allocation4 + $0x1], 0  ;;  %s829_s17 = smov 0   ;;  %s831_s18 = smov 0  }
   0x4   :  { %s833_s19 = smov 0   ;;  %s835_s20 = smov 0  }
   0x5 LB: > { %s850_s0 = sadd.s32 4294967295, %s793_s20   ;;  %s620_s21 = sadd.s32 4294967294, %s793_s20   ;;  %s793_s20 = sphi %s835_s20, %s981_s20   ;;  %s789_s19 = sphi %s833_s19, %s980_s19   ;;  %s785_s18 = sphi %s831_s18, %s979_s18   ;;  %s781_s17 = sphi %s829_s17, %s978_s17  }
   0x6   : > { %s854_s22 = sadd.s32 1, %s793_s20   ;;  %s114_s23 = sadd.s32 1, %s789_s19 }
   0x7   : > { %s111_s24 = ssub.s32 %s793_s20, %s854_s22  ;;  %p124_p0 = scmp.ne.s32.totalorder %s789_s19, %s785_s18 }
   0x8   : > { %p112_p1 = scmp.eq.s32.totalorder %s111_s24, 0  ;;  %p125_p2 = scmp.eq.s32.totalorder %s850_s0, 1 }
   0x9   : > { %p130_p3 = scmp.ne.s32.totalorder %s785_s18, %s781_s17  ;;  %p131_p4 = scmp.eq.s32.totalorder %s620_s21, 1 }
   0xa   : > { %s865_s25 = scalar_select %p112_p1, %s789_s19, %s114_s23  }
   0xb   : > { %p867_p5 = por %p125_p2, %p124_p0  ;;  %p871_p6 = por %p131_p4, %p130_p3 }
   0xc   : > { %p623_p7 = scmp.ge.s32.totalorder %s793_s20, 1  ;;  %p166_p8 = scmp.lt.s32.totalorder %s793_s20, 3 }
   0xe   : > { %p167_p9 = pnand %p623_p7, %p166_p8 }
   0xf   : > { %p192_p10 = scmp.lt.s32.totalorder (!%p167_p9), %s850_s0, 1  ;;  %s313_s24 = sld [smem:[#allocation2]] (!%p167_p9) }
  0x10   : > { %170 = sbr.rel (%p167_p9) target bundleno = 1081 (0x439), region = 36  ;;  %s189_s28 = sand.u32 (!%p167_p9), 1, %s785_s18  }
  0x11   : > { %s624_s29 = sshll.u32 (!%p167_p9), %s189_s28, 4  ;;  %s641_s6 = sshll.u32 (!%p167_p9), %s850_s0, 8 }
  0x12   : > { %s924_s9 = scalar_lea.hbm (!%p167_p9), %s975_s4, %s641_s6  ;;  %s798_s11 = smov (!%p167_p9), [#allocation3]  }
  0x13   : > { %s737_s12 = sshll.u32 (!%p167_p9), %s798_s11, 4  ;;  %s738_s12 = int_to_ptr.vmem [resolvable:$false] %s737_s12 }
  0x14   : > { %s739_s13 = scalar_lea.vmem (!%p167_p9), %s738_s12, 512 }
  0x15   : > { %v795_v0 = vmov 0.0   ;;  %vm796_vm0 = vmmov 0   ;;  %v202_v1 = vld [vmem:[%s974_s3] sm:$0xff]  ;;  %s193_s30 = scalar_select %p192_p10, %s850_s0, 1  ;;  %v797_v2 = vmov 0   ;;  %vm220_vm1 = vcmask 130048  }
  0x16   : > { %654 = vmatprep.subr.mxu0 %v795_v0  ;;  %658 = vmatprep.mubr.msk.f32.mxu0 %vm796_vm0, %v795_v0  ;;  %v199_v5 = vld [vmem:[%s973_s2] sm:$0xff]  ;;  %vm356_vm2 = vcmask 1043456   ;;  %vm349_vm3 = vcmask 31744   ;;  %v200_v14 = vld [vmem:[%s973_s2 + $0x8] sm:$0xff]  ;;  %v201_v15 = vld [vmem:[%s973_s2 + $0x10] sm:$0xff]  ;;  %v537_v48 = vstv %s313_s24  ;;  %s931_s0 = scalar_lea.sflag [#allocation4], %s189_s28 }
  0x17   : > { %723 = vset.pattern.permute.xlu0 %v797_v2  ;;  %724 = vset.pattern.permute.xlu1 %v797_v2  ;;  %s640_s5 = sshll.u32 %s193_s30, 4  ;;  %v203_v20 = vld [vmem:[%s974_s3 + $0x8] sm:$0xff]  ;;  %v204_v37 = vld [vmem:[%s974_s3 + $0x10] sm:$0xff]  ;;  %s191_s30 = scalar_lea.vmem [#allocation3], %s624_s29 }
  0x18   : > { %207 = vperm.xlu0 %723, %v202_v1   ;;  %s196_s8 = scalar_lea.vmem %s972_s1, %s640_s5  ;;  %s558_s5 = sshll.u32 %s191_s30, 4  ;;  %s926_s5 = int_to_ptr.vmem [resolvable:$true] %s558_s5 }
  0x19   : > { %v886_v3 = vld [vmem:[%s196_s8 + $0x8] sm:$0xff]  ;;  %v888_v4 = vld [vmem:[%s196_s8] sm:$0xff]  ;;  %s733_s10 = scalar_lea.vmem %s926_s5, 256  ;;  %p740_p0 = scmp.lt.s32.totalorder %s926_s5, %s738_s12 }
  0x1a   : > { %655 = vmatpush3.msra.mxu0 %v886_v3  ;;  %p734_p11 = scmp.ne.s32.totalorder %s926_s5, %s733_s10  ;;  %p741_p1 = scmp.lt.s32.totalorder %s739_s13, %s733_s10 }
  0x1b   : > { %656 = vmatprep.subr.mxu0 %v795_v0 }
  0x1c   : > { %657 = vmatpush3.msra.mxu0 %v888_v4  ;;  %p735_p12 = pnand %p734_p11, %p867_p5  ;;  %p742_p2 = por %p741_p1, %p740_p0 }
  0x1d   : > { %659 = vmatmul.mubr.msk.f32.vlgmr.msra.gmra.mxu0 %vm220_vm1, %v199_v5 }
  0x1e   : > { %661 = vmatprep.mubr.msk.f32.mxu0 %vm796_vm0, %v795_v0  ;;  %p736_p13 = pneg %p735_p12 }
  0x20   : > { %p743_p3 = pnand %p742_p2, %p736_p13 }
  0x21   : > { %662 = vmatmul.mubr.msk.f32.gmra.mxu0 %vm220_vm1, %v200_v14 }
  0x22   : > { %664 = vmatprep.mubr.msk.f32.mxu0 %vm796_vm0, %v795_v0 }
  0x25   : > { %665 = vmatmul.mubr.msk.f32.gmra.mxu0 %vm220_vm1, %v201_v15 }
  0x93   : > { %v208_v6 = vpop.permute.xlu0 %207 }
  0xdd   : > { %v296_v7 = vpop.f32.mrf.mxu0 }
  0xde   : > { %v297_v8 = vadd.f32 %v296_v7, %v208_v6 }
  0xdf   : > { %v660_v9 = vpop.f32.mrf.mxu0 }
  0xe0   : > { %v310_v10 = vmax.f32 %v297_v8, 0.0 }
  0xe1   : > { %v301_v21 = vpop.f32.mrf.mxu0 }
  0xe2   : > { %667 = vmatprep.subr.msk.mxu1 %vm356_vm2, %v310_v10  ;;  %v315_v11 = vrot.slane %v310_v10, 4 }
  0xe3   : > { %668 = vmatpush3.msk.msra.mxu1 %vm356_vm2, %v310_v10  ;;  %v663_v22 = vpop.f32.mrf.mxu0 }
  0xe4   : > { %317 = vxpose.xlu0.b32.start.end [1/1] (short) (narrow) %v315_v11, 16 }
  0xe5   : > { %v306_v36 = vpop.f32.mrf.mxu0 }
  0xe7   : > { %v666_v38 = vpop.f32.mrf.mxu0 }
 0x160   : > { %v333_v12 = vpop.trf.xlu0 }
 0x161   : > { %669 = vmatprep.mubr.msk.f32.mxu1 %vm349_vm3, %v333_v12 }
 0x164   : > { %v334_v13 = vpop.trf.xlu0 }
 0x165   : > { %670 = vmatmul.mubr.msk.f32.vlgmr.msra.gmra.mxu1 %vm349_vm3, %v334_v13 }
 0x225   : > { %v671_v16 = vpop.f32.mrf.mxu1 }
 0x226   : > { %v437_v17 = vsel %vm220_vm1, %v671_v16, -inf }
 0x227   : > { %438 = vmax.xlane.f32.xlu1 %v437_v17  ;;  %v425_v18 = vpop.f32.mrf.mxu1 }
 0x228   : > { %v434_v19 = vsel %vm220_vm1, %v425_v18, -inf }
 0x22b   : > { %435 = vmax.xlane.f32.xlu1 %v434_v19 }
 0x23c   : > { %212 = vperm.xlu1 %724, %v203_v20  }
 0x2b0   : > { %v439_v23 = vpop.xlane.xlu1 %438 }
 0x2b1   : > { %v441_v24 = vsub.f32 %v671_v16, %v439_v23 }
 0x2b3   : > { %v444_v25 = vmul.f32 1.442695, %v441_v24 }
 0x2b4   : > { %v436_v26 = vpop.xlane.xlu1 %435 }
 0x2b5   : > { %725 = vpow2.f32 %v444_v25  ;;  %v440_v27 = vsub.f32 %v425_v18, %v436_v26 }
 0x2b7   : > { %v442_v28 = vmul.f32 1.442695, %v440_v27 }
 0x2b8   : > { %v213_v29 = vpop.permute.xlu1 %212 }
 0x2b9   : > { %727 = vpow2.f32 %v442_v28  ;;  %v302_v30 = vadd.f32 %v301_v21, %v213_v29 }
 0x2bb   : > { %v311_v31 = vmax.f32 %v302_v30, 0.0 }
 0x2bd   : > { %676 = vmatprep.mubr.msk.f32.mxu1 %vm220_vm1, %v311_v31 }
 0x2c2   : > { %v726_v32 = vpop.eup %725 }
 0x2c3   : > { %v449_v33 = vsel %vm220_vm1, %v726_v32, 0.0 }
 0x2c4   : > { %450 = vadd.xlane.f32.xlu1 %v449_v33 }
 0x2c6   : > { %v728_v34 = vpop.eup %727 }
 0x2c7   : > { %v446_v35 = vsel %vm220_vm1, %v728_v34, 0.0 }
 0x2c8   : > { %447 = vadd.xlane.f32.xlu1 %v446_v35 }
 0x2d9   : > { %217 = vperm.xlu1 %724, %v204_v37  }
 0x34d   : > { %v451_v39 = vpop.xlane.xlu1 %450 }
 0x34e   : > { %729 = vrcp.f32 %v451_v39 }
 0x351   : > { %v448_v40 = vpop.xlane.xlu1 %447 }
 0x352   : > { %731 = vrcp.f32 %v448_v40 }
 0x355   : > { %v218_v42 = vpop.permute.xlu1 %217 }
 0x356   : > { %v307_v44 = vadd.f32 %v306_v36, %v218_v42 }
 0x358   : > { %v312_v47 = vmax.f32 %v307_v44, 0.0 }
 0x35b   : > { %v730_v41 = vpop.eup %729 }
 0x35c   : > { %v455_v43 = vmul.f32 %v730_v41, %v726_v32 }
 0x35e   : > { %672 = vmatprep.subr.mxu1 %v455_v43 }
 0x35f   : > { %v732_v45 = vpop.eup %731  ;;  %673 = vmatpush3.msra.mxu1 %v455_v43 }
 0x360   : > { %v454_v46 = vmul.f32 %v732_v45, %v728_v34 }
 0x362   : > { %674 = vmatprep.subr.mxu1 %v454_v46 }
 0x363   : > { %675 = vmatpush3.msra.mxu1 %v454_v46 }
 0x364   : > { %677 = vmatmul.mubr.msk.f32.vlgmr.msra.gmra.mxu1 %vm220_vm1, %v312_v47 }
 0x424   : > { %v678_v49 = vpop.f32.mrf.mxu1 }
 0x425   : > { %v539_v50 = vmul.f32 %v678_v49, %v537_v48 }
 0x426   : > { %v528_v51 = vpop.f32.mrf.mxu1 }
 0x427   : > { %v541_v52 = vadd.f32 %v539_v50, %v886_v3  ;;  %v538_v53 = vmul.f32 %v537_v48, %v528_v51 }
 0x429   : > { %543 = vst.msk [vmem:[%s191_s30 + $0x8] sm:$0xff] %vm220_vm1, %v541_v52  ;;  %v540_v54 = vadd.f32 %v538_v53, %v888_v4 }
 0x42b   : > { %542 = vst.msk [vmem:[%s191_s30] sm:$0xff] %vm220_vm1, %v540_v54 }
 0x42c   : > { %746 = shalt.err (!%p743_p3)
}
 0x42d   : > { %s747_s14 = scalar_lea.hbm %s924_s9, 256  ;;  %s751_s21 = scalar_lea.hbm %s975_s4, 512 }
 0x42e   : > { %p748_p4 = scmp.ne.s32.totalorder %s924_s9, %s747_s14  ;;  %p752_p9 = scmp.lt.s32.totalorder %s924_s9, %s975_s4 }
 0x42f   : > { %p753_p10 = scmp.lt.s32.totalorder %s751_s21, %s747_s14 }
 0x430   : > { %p749_p7 = pnand %p748_p4, %p867_p5 }
 0x431   : > { %p754_p11 = por %p753_p10, %p752_p9 }
 0x432   : > { %p750_p8 = pneg %p749_p7 }
 0x434   : > { %p755_p12 = pnand %p754_p11, %p750_p8 }
 0x436   : > { %758 = shalt.err (!%p755_p12)
}
 0x437   : > { %s799_s28 = smov 128   ;;  %s800_s29 = smov 8  }
 0x438   : > { %679 = dma.vmem_to_hbm [thread:$0]  (%p867_p5), %s926_s5, 256, %s924_s9, %s931_s0, %s799_s28, %s799_s28, %s800_s29  }
 0x439 PF: > { %p685_p13 = scmp.ge.s32.totalorder %s793_s20, 2  ;;  %s573_s30 = sand.u32 1, %s781_s17  }
 0x43a   : > { %s574_s6 = scalar_lea.sflag [#allocation4], %s573_s30 }
 0x43b   : > { %p682_p0 = pnand %p685_p13, %p871_p6 }
 0x43d   : > { %p683_p1 = pneg %p682_p0 }
 0x43f   : > { %776 = dma.done.wait (%p683_p1), %s574_s6, 256  }
 0x440   : > { %778 = vsyncadd (%p683_p1), %s574_s6, 4294967040  ;;  %p15_p2 = scmp.ge.s32.totalorder %s854_s22, 4   ;;  %s978_s17 = smov %s785_s18 }
 0x441   : > { %s979_s18 = smov %s789_s19  ;;  %s980_s19 = smov %s865_s25 }
 0x442   : > { %s981_s20 = smov %s854_s22  ;;  %17 = sbr.rel (!%p15_p2) target bundleno = 5 (0x5), region = 71 }
 0x447   :  { %579 = vsyncpa [#allocation4], 1 }
 0x448   :  { %581 = vsyncpa [#allocation4 + $0x1], 1 }

</bundles_post_ra>
